<compile_context>
chip_gen: v7x
topology: tpu7x:2x2x1
jax: 0.10.0
libtpu: 0.0.40
codegen_flags: <defaults>
</compile_context>

<pallas_src>
import jax
import jax.numpy as jnp
from jax.experimental import pallas as pl
from jax.experimental.pallas import tpu as pltpu


def _attn_kernel(e_ref, w_ref, s_ref, a_ref, d_ref, o_ref):
    # e_ref: (L, D)           candidate embeddings (shared, resident)
    # w_ref: (Bn*M, 1)        value-Linear weight, repeated per batch row
    # s_ref: (L*Dd, L)        Dd-fold matrix (block-diagonal ones, shared)
    # a_ref: (Bn*M, D)        self_attn block (rows = (b, m))
    # d_ref: (Bn*M, L*Dd)     self_delta block, trailing dims merged (lane dense)
    # o_ref: (Bn, L)          output block
    bn, l = o_ref.shape
    m = a_ref.shape[0] // bn

    # Fold the value-Linear weight into the small operand (VPU, broadcast over D).
    a_w = a_ref[...] * w_ref[...]                                  # (Bn*M, D)

    # Candidate-embedding matmul across the whole batch block (MXU):
    # (Bn*M, D) x (L, D)^T -> (Bn*M, L)
    scores = jax.lax.dot_general(
        a_w, e_ref[...], (((1,), (1,)), ((), ())),
        preferred_element_type=jnp.float32)

    # Dd fold on the MXU: (Bn*M, L*Dd) x (L*Dd, L) -> (Bn*M, L)
    delta = jax.lax.dot_general(
        d_ref[...], s_ref[...], (((1,), (0,)), ((), ())),
        preferred_element_type=jnp.float32)

    weighted = scores * delta                                      # VPU

    # Contraction over M (value Linear already applied): sublane reduction.
    out = jnp.sum(weighted.reshape(bn, m, l), axis=1)              # (Bn, L)
    o_ref[...] = out.astype(o_ref.dtype)


def attn_forward(self_attn, self_delta, traj_len, emb_table, value_w, loc_max,
                 block_n=None):
    """Pallas equivalent of Attn.forward.

    self_attn : [N, M, D] float32
    self_delta: [N, M, L, Dd] float32 (L == loc_max, M == max_len)
    traj_len  : unused (kept for signature parity with the PyTorch module)
    emb_table : [loc_max + 1, D] embedding weights (row 0 unused)
    value_w   : [1, M] weight of nn.Linear(max_len, 1, bias=False)
    """
    del traj_len  # unused by the PyTorch forward as well
    N, M, D = self_attn.shape
    L = int(loc_max)
    Dd = self_delta.shape[-1]
    assert self_delta.shape == (N, M, L, Dd)

    # candidates = [1, ..., loc_max] -> shared embedding slab (glue).
    emb_candidates = emb_table[1:L + 1, :]                         # (L, D)
    # Dd-fold matrix: fold[c, l] = 1 iff c // Dd == l.
    fold = (jnp.arange(L * Dd)[:, None] // Dd ==
            jnp.arange(L)[None, :]).astype(self_attn.dtype)        # (L*Dd, L)

    # Batch-block size: big enough to amortize per-step overhead (~0.35us),
    # small enough that double-buffered inputs fit comfortably in every
    # generation's scoped VMEM.
    if block_n is None:
        per_elem_bytes = (M * D + M * L * Dd + L) * 4
        budget = 8 * 1024 * 1024                                   # per step
        block_n = min(N, 1024, max(1, budget // (2 * per_elem_bytes)))
    block_n = max(8, (block_n // 8) * 8)   # keep output sublane dim tileable

    Np = pl.cdiv(N, block_n) * block_n
    a_in, d_in = self_attn, self_delta
    if Np != N:
        pad = Np - N
        a_in = jnp.pad(a_in, ((0, pad), (0, 0), (0, 0)))
        d_in = jnp.pad(d_in, ((0, pad), (0, 0), (0, 0), (0, 0)))

    # Free contiguous merges (no transpose): 2-D, lane-dense slabs.
    a2 = a_in.reshape(Np * M, D)
    d2 = d_in.reshape(Np * M, L * Dd)

    # value weight repeated per batch row of the block: w_col[b*M + m] = w[m].
    w_col = jnp.tile(value_w.reshape(M, 1), (block_n, 1))          # (Bn*M, 1)

    out = pl.pallas_call(
        _attn_kernel,
        out_shape=jax.ShapeDtypeStruct((Np, L), self_attn.dtype),
        grid_spec=pltpu.PrefetchScalarGridSpec(
            num_scalar_prefetch=0,
            grid=(Np // block_n,),
            in_specs=[
                pl.BlockSpec((L, D), lambda n: (0, 0)),               # shared
                pl.BlockSpec((block_n * M, 1), lambda n: (0, 0)),     # shared
                pl.BlockSpec((L * Dd, L), lambda n: (0, 0)),          # shared
                pl.BlockSpec((block_n * M, D), lambda n: (n, 0)),
                pl.BlockSpec((block_n * M, L * Dd), lambda n: (n, 0)),
            ],
            out_specs=pl.BlockSpec((block_n, L), lambda n: (n, 0)),
        ),
        compiler_params=pltpu.CompilerParams(
            dimension_semantics=("parallel",)),
    )(emb_candidates, w_col, fold, a2, d2)
    return out[:N]


def _reference(self_attn, self_delta, emb_table, value_w, loc_max):
    # pure-JAX mirror of the PyTorch forward for validation
    delta = jnp.swapaxes(jnp.sum(self_delta, -1), -1, -2)          # (N, L, M)
    N = self_attn.shape[0]
    L = int(loc_max)
    emb_cand = jnp.broadcast_to(emb_table[1:L + 1, :], (N, L, emb_table.shape[1]))
    attn = jnp.einsum("nld,nmd->nlm", emb_cand, self_attn) * delta
    return jnp.einsum("nlm,m->nl", attn, value_w[0])


if __name__ == "__main__":
    # N=batch, M=max_len, L=loc_max, D=emb_dim, Dd=delta feature dim
    N, M, L, D, Dd = 16, 8, 16, 32, 4

    key = jax.random.PRNGKey(0)
    k1, k2, k3, k4 = jax.random.split(key, 4)

    self_attn = jax.random.normal(k1, (N, M, D), dtype=jnp.float32)
    self_delta = jax.random.normal(k2, (N, M, L, Dd), dtype=jnp.float32)
    traj_len = jnp.full((N,), M, dtype=jnp.int32)        # unused by forward

    # deterministic synthetic parameters (no checkpoint loading)
    emb_table = jax.random.normal(k3, (L + 1, D), dtype=jnp.float32) * 0.1
    value_w = jax.random.normal(k4, (1, M), dtype=jnp.float32) * 0.1

    # block_n=8 -> grid of 2 steps so the multi-block / megacore path is exercised.
    out = attn_forward(self_attn, self_delta, traj_len, emb_table, value_w,
                       loc_max=L, block_n=8)
    out = jax.block_until_ready(out)

    ref = _reference(self_attn, self_delta, emb_table, value_w, L)
    assert out.shape == (N, L)
    assert jnp.allclose(out, ref, atol=1e-4, rtol=1e-4)
    print("KERNEL_OK")
</pallas_src>

<mosaic_0001>
module attributes {stable_mosaic.version = 11 : i64} {
  func.func @_attn_kernel(%arg0: i32, %arg1: memref<16x32xf32, #tpu.memory_space<vmem>>, %arg2: memref<64x1xf32, #tpu.memory_space<vmem>>, %arg3: memref<64x16xf32, #tpu.memory_space<vmem>>, %arg4: memref<64x32xf32, #tpu.memory_space<vmem>>, %arg5: memref<64x64xf32, #tpu.memory_space<vmem>>, %arg6: memref<8x16xf32, #tpu.memory_space<vmem>>) attributes {dimension_semantics = [#tpu.dimension_semantics<parallel>], iteration_bounds = array<i64: 2>, scalar_prefetch = 0 : i64, scratch_operands = 0 : i64, tpu.core_type = #tpu.core_type<tc>, window_params = [{pipeline_mode = #tpu.pipeline_mode<synchronous>, transform_indices = @transform_0, window_bounds = array<i64: 16, 32>}, {pipeline_mode = #tpu.pipeline_mode<synchronous>, transform_indices = @transform_1, window_bounds = array<i64: 64, 1>}, {pipeline_mode = #tpu.pipeline_mode<synchronous>, transform_indices = @transform_2, window_bounds = array<i64: 64, 16>}, {transform_indices = @transform_3, window_bounds = array<i64: 64, 32>}, {transform_indices = @transform_4, window_bounds = array<i64: 64, 64>}, {transform_indices = @transform_5, window_bounds = array<i64: 8, 16>}]} {
    %c0 = arith.constant 0 : index
    %c0_0 = arith.constant 0 : index
    %0 = vector.load %arg4[%c0, %c0_0] : memref<64x32xf32, #tpu.memory_space<vmem>>, vector<64x32xf32>
    %c0_1 = arith.constant 0 : index
    %c0_2 = arith.constant 0 : index
    %1 = vector.load %arg2[%c0_1, %c0_2] : memref<64x1xf32, #tpu.memory_space<vmem>>, vector<64x1xf32>
    %2 = vector.broadcast %1 : vector<64x1xf32> to vector<64x32xf32>
    %3 = arith.mulf %0, %2 : vector<64x32xf32>
    %c0_3 = arith.constant 0 : index
    %c0_4 = arith.constant 0 : index
    %4 = vector.load %arg1[%c0_3, %c0_4] : memref<16x32xf32, #tpu.memory_space<vmem>>, vector<16x32xf32>
    %cst = arith.constant dense<0.000000e+00> : vector<64x16xf32>
    %5 = tpu.matmul %3, %4, %cst {dimension_numbers = #tpu.dot_dimension_numbers<[1], [1], [0], [0], [0, 0, 1, 0], [], []>} : vector<64x32xf32>, vector<16x32xf32>, vector<64x16xf32> -> vector<64x16xf32>
    %c0_5 = arith.constant 0 : index
    %c0_6 = arith.constant 0 : index
    %6 = vector.load %arg5[%c0_5, %c0_6] : memref<64x64xf32, #tpu.memory_space<vmem>>, vector<64x64xf32>
    %c0_7 = arith.constant 0 : index
    %c0_8 = arith.constant 0 : index
    %7 = vector.load %arg3[%c0_7, %c0_8] : memref<64x16xf32, #tpu.memory_space<vmem>>, vector<64x16xf32>
    %cst_9 = arith.constant dense<0.000000e+00> : vector<64x16xf32>
    %8 = tpu.matmul %6, %7, %cst_9 {dimension_numbers = #tpu.dot_dimension_numbers<[1], [0], [0], [1], [0, 0, 1, 1], [], []>} : vector<64x64xf32>, vector<64x16xf32>, vector<64x16xf32> -> vector<64x16xf32>
    %9 = arith.mulf %5, %8 : vector<64x16xf32>
    %10 = vector.shape_cast %9 : vector<64x16xf32> to vector<8x8x16xf32>
    %cst_10 = arith.constant dense<0.000000e+00> : vector<8x16xf32>
    %11 = vector.multi_reduction <add>, %10, %cst_10 [1] : vector<8x8x16xf32> to vector<8x16xf32>
    %c0_11 = arith.constant 0 : index
    %c0_12 = arith.constant 0 : index
    %12 = vector.load %arg6[%c0_11, %c0_12] : memref<8x16xf32, #tpu.memory_space<vmem>>, vector<8x16xf32>
    tpu.vector_store %arg6[%c0_11, %c0_12], %11 {strides = array<i32>} : memref<8x16xf32, #tpu.memory_space<vmem>>, vector<8x16xf32>,
    return
  }
  func.func @transform_0(%arg0: i32) -> (i32, i32) {
    %c0_i32 = arith.constant 0 : i32
    %c0_i32_0 = arith.constant 0 : i32
    %c0_i32_1 = arith.constant 0 : i32
    return %c0_i32, %c0_i32_0 : i32, i32
  }
  func.func @transform_1(%arg0: i32) -> (i32, i32) {
    %c0_i32 = arith.constant 0 : i32
    %c0_i32_0 = arith.constant 0 : i32
    %c0_i32_1 = arith.constant 0 : i32
    return %c0_i32, %c0_i32_0 : i32, i32
  }
  func.func @transform_2(%arg0: i32) -> (i32, i32) {
    %c0_i32 = arith.constant 0 : i32
    %c0_i32_0 = arith.constant 0 : i32
    %c0_i32_1 = arith.constant 0 : i32
    return %c0_i32, %c0_i32_0 : i32, i32
  }
  func.func @transform_3(%arg0: i32) -> (i32, i32) {
    %c0_i32 = arith.constant 0 : i32
    %c0_i32_0 = arith.constant 0 : i32
    return %arg0, %c0_i32 : i32, i32
  }
  func.func @transform_4(%arg0: i32) -> (i32, i32) {
    %c0_i32 = arith.constant 0 : i32
    %c0_i32_0 = arith.constant 0 : i32
    return %arg0, %c0_i32 : i32, i32
  }
  func.func @transform_5(%arg0: i32) -> (i32, i32) {
    %c0_i32 = arith.constant 0 : i32
    %c0_i32_0 = arith.constant 0 : i32
    return %arg0, %c0_i32 : i32, i32
  }
}

</mosaic_0001>

<bundles_post_ra>
// kernel: tpu_custom_call.1
= control target key start
LH: loop header
LB: loop body
LE: loop exit
PB: predicated region body
PF: predicated region fallthrough
CT: control target
= control target key end

     0   :  { %10 = vsyncpa [#allocation3], 0  ;;  %s1279_s0 = inlined_call_operand.vmem [shape: f32[16,32], index: 0, kind: input, shape index: {}]   ;;  %s1280_s1 = inlined_call_operand.vmem [shape: f32[64,1], index: 1, kind: input, shape index: {}]   ;;  %s1281_s2 = inlined_call_operand.vmem [shape: f32[64,16], index: 2, kind: input, shape index: {}]   ;;  %s1282_s3 = inlined_call_operand.vmem [shape: f32[128,32], index: 3, kind: input, shape index: {}]   ;;  %s1283_s4 = inlined_call_operand.vmem [shape: f32[128,64], index: 4, kind: input, shape index: {}]   ;;  %s1284_s5 = inlined_call_operand.hbm [shape: f32[16,16], index: 5, kind: output, shape index: {}]  }
   0x1   :  { %12 = vsyncpa [#allocation3 + $0x1], 0  ;;  %s1038_s18 = smov 0   ;;  %s1040_s19 = smov 0  }
   0x2   :  { %s1042_s20 = smov 0   ;;  %s1044_s21 = smov 0  }
   0x3 LB: > { %s1059_s22 = sadd.s32 4294967295, %s1004_s21   ;;  %s769_s23 = sadd.s32 4294967294, %s1004_s21   ;;  %s1004_s21 = sphi %s1044_s21, %s1291_s21   ;;  %s1000_s20 = sphi %s1042_s20, %s1290_s20   ;;  %s996_s19 = sphi %s1040_s19, %s1289_s19   ;;  %s992_s18 = sphi %s1038_s18, %s1288_s18  }
   0x4   : > { %s1063_s24 = sadd.s32 1, %s1004_s21   ;;  %s140_s25 = sadd.s32 1, %s1000_s20 }
   0x5   : > { %s137_s26 = ssub.s32 %s1004_s21, %s1063_s24  ;;  %p150_p0 = scmp.ne.s32.totalorder %s1000_s20, %s996_s19 }
   0x6   : > { %p138_p1 = scmp.eq.s32.totalorder %s137_s26, 0  ;;  %p151_p2 = scmp.eq.s32.totalorder %s1059_s22, 1 }
   0x7   : > { %p156_p3 = scmp.ne.s32.totalorder %s996_s19, %s992_s18  ;;  %p157_p4 = scmp.eq.s32.totalorder %s769_s23, 1 }
   0x8   : > { %s1074_s27 = scalar_select %p138_p1, %s1000_s20, %s140_s25  }
   0x9   : > { %p1076_p5 = por %p151_p2, %p150_p0  ;;  %p1080_p6 = por %p157_p4, %p156_p3 }
   0xa   : > { %p772_p7 = scmp.ge.s32.totalorder %s1004_s21, 1  ;;  %p202_p8 = scmp.lt.s32.totalorder %s1004_s21, 3 }
   0xc   : > { %p203_p9 = pnand %p772_p7, %p202_p8 }
   0xd   : > { %v257_v0 = vld [vmem:[%s1280_s1 + $0x10] sm:$0xff] (!%p203_p9)  ;;  %v255_v1 = vld [vmem:[%s1280_s1] sm:$0xff] (!%p203_p9)  ;;  %s774_s9 = sshll.u32 (!%p203_p9), %s1059_s22, 3  ;;  %v1006_v2 = vmov (!%p203_p9), 0   ;;  %vm313_vm0 = vcmask (!%p203_p9), 261120   ;;  %v258_v3 = vld [vmem:[%s1280_s1 + $0x18] sm:$0xff] (!%p203_p9) }
   0xe   : > { %206 = sbr.rel (%p203_p9) target bundleno = 414 (0x19e), region = 40  ;;  %941 = vset.pattern.permute.xlu1 (!%p203_p9), %v1006_v2  ;;  %940 = vset.pattern.permute.xlu0 (!%p203_p9), %v1006_v2  ;;  %p1093_p10 = scmp.lt.s32.totalorder (!%p203_p9), %s774_s9, 15  ;;  %v256_v4 = vld [vmem:[%s1280_s1 + $0x8] sm:$0xff] (!%p203_p9)  ;;  %v457_v5 = vld [vmem:[%s1281_s2] sm:$0xff] (!%p203_p9)  ;;  %vm871_vm1 = vmpackc.low (!%p203_p9), %vm313_vm0, %vm313_vm0  ;;  %vm465_vm2 = vcmask (!%p203_p9), 523264   ;;  %vm603_vm3 = vcmask (!%p203_p9), 130048  }
   0xf   : > { %275 = vperm.xlu1 (!%p203_p9), %941, %v257_v0   ;;  %265 = vperm.xlu0 (!%p203_p9), %940, %v255_v1   ;;  %v458_v6 = vld [vmem:[%s1281_s2 + $0x8] sm:$0xff] (!%p203_p9)  ;;  %v311_v7 = vld [vmem:[%s1279_s0] sm:$0xff] (!%p203_p9)  ;;  %v459_v11 = vld [vmem:[%s1281_s2 + $0x10] sm:$0xff] (!%p203_p9)  ;;  %vm668_vm4 = vcmask (!%p203_p9), 1041409   ;;  %vm670_vm5 = vcmask (!%p203_p9), 1042434   ;;  %vm672_vm6 = vcmask (!%p203_p9), 1043459  }
  0x10   : > { %v312_v8 = vld [vmem:[%s1279_s0 + $0x8] sm:$0xff] (!%p203_p9)  ;;  %v1115_v9 = vpack.c.bf16 (!%p203_p9), %v458_v6, %v457_v5  ;;  %v460_v12 = vld [vmem:[%s1281_s2 + $0x18] sm:$0xff] (!%p203_p9)  ;;  %v461_v14 = vld [vmem:[%s1281_s2 + $0x20] sm:$0xff] (!%p203_p9)  ;;  %vm674_vm7 = vcmask (!%p203_p9), 1044484   ;;  %vm676_vm8 = vcmask (!%p203_p9), 1045509   ;;  %vm678_vm9 = vcmask (!%p203_p9), 1046534  }
  0x11   : > { %v870_v10 = vpack.c.bf16 (!%p203_p9), %v312_v8, %v311_v7  ;;  %v1129_v13 = vpack.c.bf16 (!%p203_p9), %v460_v12, %v459_v11  ;;  %v462_v15 = vld [vmem:[%s1281_s2 + $0x28] sm:$0xff] (!%p203_p9)  ;;  %v259_v17 = vld [vmem:[%s1280_s1 + $0x20] sm:$0xff] (!%p203_p9)  ;;  %v463_v19 = vld [vmem:[%s1281_s2 + $0x30] sm:$0xff] (!%p203_p9)  ;;  %s797_s30 = sshll.u32 (!%p203_p9), %s1059_s22, 7  ;;  %vm680_vm10 = vcmask (!%p203_p9), 1047559   ;;  %s1007_s14 = smov (!%p203_p9), [#allocation2]  }
  0x12   : > { %v260_v16 = vld [vmem:[%s1280_s1 + $0x28] sm:$0xff] (!%p203_p9)  ;;  %892 = vmatprep.subr.bf16.mxu1 (!%p203_p9), %v1115_v9  ;;  %v1147_v18 = vpack.c.bf16 (!%p203_p9), %v462_v15, %v461_v14  ;;  %v464_v20 = vld [vmem:[%s1281_s2 + $0x38] sm:$0xff] (!%p203_p9)  ;;  %v261_v23 = vld [vmem:[%s1280_s1 + $0x30] sm:$0xff] (!%p203_p9)  ;;  %s1234_s12 = scalar_lea.hbm (!%p203_p9), %s1284_s5, %s797_s30  ;;  %s946_s15 = sshll.u32 (!%p203_p9), %s1007_s14, 4  ;;  %s947_s15 = int_to_ptr.vmem [resolvable:$false] %s946_s15 }
  0x13   : > { %280 = vperm.xlu1 (!%p203_p9), %941, %v258_v3   ;;  %270 = vperm.xlu0 (!%p203_p9), %940, %v256_v4   ;;  %v262_v22 = vld [vmem:[%s1280_s1 + $0x38] sm:$0xff] (!%p203_p9)  ;;  %v888_v24 = vpack.c.bf16 (!%p203_p9), %v464_v20, %v463_v19  ;;  %s948_s16 = scalar_lea.vmem (!%p203_p9), %s947_s15, 256 }
  0x14   : > { %872 = vmatprep.subr.msk.bf16.mxu0 (!%p203_p9), %vm871_vm1, %v870_v10  ;;  %896 = vmatpush3.bf16.msra.mxu1 (!%p203_p9), %v1115_v9 }
  0x15   : > { %s1293_s9 = smov (!%p1093_p10, %s774_s9), 15  ;;  %875 = vmatpush3.bf16.xpose.msk.msra.mxu0 %vm871_vm1, %v870_v10  ;;  %893 = vmatprep.subr.bf16.mxu1 %v1129_v13 }
  0x16   : > { %s775_s26 = sshll.u32 %s1293_s9, 3  ;;  %877 = vmatprep.subr.bf16.mxu0 %v1115_v9  ;;  %s232_s9 = sand.u32 1, %s996_s19  }
  0x17   : > { %s1155_s7 = scalar_lea.vmem %s1283_s4, %s775_s26  ;;  %290 = vperm.xlu1 %941, %v260_v16   ;;  %285 = vperm.xlu0 %940, %v259_v17   ;;  %s1189_s25 = scalar_lea.vmem %s1282_s3, %s775_s26 }
  0x18   : > { %v451_v21 = vld [vmem:[%s1155_s7 + $0x10] sm:$0xff]  ;;  %897 = vmatpush3.bf16.msra.mxu1 %v1129_v13  ;;  %v452_v25 = vld [vmem:[%s1155_s7 + $0x18] sm:$0xff]  ;;  %v453_v26 = vld [vmem:[%s1155_s7 + $0x20] sm:$0xff]  ;;  %s1227_s26 = sshll.u32 %s232_s9, 3  ;;  %s685_s22 = scalar_lea.sflag [#allocation3], %s232_s9 }
  0x19   : > { %861 = vmatprep.mubr.msk.f32.mxu1 %vm465_vm2, %v451_v21  ;;  %894 = vmatprep.subr.bf16.mxu1 %v1147_v18  ;;  %v454_v27 = vld [vmem:[%s1155_s7 + $0x28] sm:$0xff]  ;;  %v455_v28 = vld [vmem:[%s1155_s7 + $0x30] sm:$0xff]  ;;  %v456_v29 = vld [vmem:[%s1155_s7 + $0x38] sm:$0xff]  ;;  %s234_s6 = scalar_lea.vmem [#allocation2], %s1227_s26 }
  0x1a   : > { %v247_v30 = vld [vmem:[%s1189_s25] sm:$0xff]  ;;  %v249_v33 = vld [vmem:[%s1189_s25 + $0x10] sm:$0xff]  ;;  %v248_v35 = vld [vmem:[%s1189_s25 + $0x8] sm:$0xff] }
  0x1b   : > { %300 = vperm.xlu1 %941, %v262_v22   ;;  %295 = vperm.xlu0 %940, %v261_v23   ;;  %v250_v40 = vld [vmem:[%s1189_s25 + $0x18] sm:$0xff]  ;;  %v251_v41 = vld [vmem:[%s1189_s25 + $0x20] sm:$0xff]  ;;  %v252_v46 = vld [vmem:[%s1189_s25 + $0x28] sm:$0xff] }
  0x1c   : > { %898 = vmatpush3.bf16.msra.mxu1 %v1147_v18  ;;  %v253_v47 = vld [vmem:[%s1189_s25 + $0x30] sm:$0xff]  ;;  %v254_v52 = vld [vmem:[%s1189_s25 + $0x38] sm:$0xff]  ;;  %v449_v54 = vld [vmem:[%s1155_s7] sm:$0xff] }
  0x1d   : > { %895 = vmatprep.subr.bf16.mxu1 %v888_v24  ;;  %v450_v55 = vld [vmem:[%s1155_s7 + $0x8] sm:$0xff]  ;;  %s698_s7 = sshll.u32 %s234_s6, 4  ;;  %s1236_s7 = int_to_ptr.vmem [resolvable:$true] %s698_s7 }
  0x1e   : > { %s942_s13 = scalar_lea.vmem %s1236_s7, 128  ;;  %p949_p0 = scmp.lt.s32.totalorder %s1236_s7, %s947_s15 }
  0x1f   : > { %p943_p11 = scmp.ne.s32.totalorder %s1236_s7, %s942_s13  ;;  %p950_p1 = scmp.lt.s32.totalorder %s948_s16, %s942_s13 }
  0x20   : > { %899 = vmatpush3.bf16.msra.mxu1 %v888_v24 }
  0x21   : > { %p944_p12 = pnand %p943_p11, %p1076_p5  ;;  %p951_p2 = por %p950_p1, %p949_p0 }
  0x23   : > { %862 = vmatmul.mubr.msk.f32.vlgmr.msra.gmra.mrb[0].mxu1 %vm465_vm2, %v452_v25  ;;  %p945_p13 = pneg %p944_p12 }
  0x24   : > { %864 = vmatprep.mubr.msk.f32.mxu1 %vm465_vm2, %v453_v26 }
  0x25   : > { %p952_p3 = pnand %p951_p2, %p945_p13 }
  0x27   : > { %865 = vmatmul.mubr.msk.f32.gmra.mrb[2].mxu1 %vm465_vm2, %v454_v27 }
  0x28   : > { %867 = vmatprep.mubr.msk.f32.mxu1 %vm465_vm2, %v455_v28 }
  0x2b   : > { %868 = vmatmul.mubr.msk.f32.gmra.mrb[4].mxu1 %vm465_vm2, %v456_v29 }
  0x8e   : > { %v276_v31 = vpop.permute.xlu1 %275  ;;  %v266_v32 = vpop.permute.xlu0 %265 }
  0x8f   : > { %v303_v34 = vmul.f32 %v266_v32, %v247_v30  ;;  %v305_v36 = vmul.f32 %v276_v31, %v249_v33 }
  0x91   : > { %830 = vmatprep.mubr.msk.f32.mxu0 %vm313_vm0, %v303_v34 }
  0x92   : > { %v281_v37 = vpop.permute.xlu1 %280  ;;  %v271_v38 = vpop.permute.xlu0 %270 }
  0x93   : > { %v304_v39 = vmul.f32 %v271_v38, %v248_v35  ;;  %v306_v44 = vmul.f32 %v281_v37, %v250_v40 }
  0x95   : > { %831 = vmatmul.mubr.msk.f32.vlgmr.msra.gmra.mrb[0].mxu0 %vm313_vm0, %v304_v39 }
  0x96   : > { %879 = vmatpush3.bf16.msra.mxu0 %v1115_v9  ;;  %v291_v42 = vpop.permute.xlu1 %290  ;;  %v286_v43 = vpop.permute.xlu0 %285  ;;  %833 = vmatprep.mubr.msk.f32.mxu0 %vm313_vm0, %v305_v36 }
  0x97   : > { %v307_v45 = vmul.f32 %v286_v43, %v251_v41  ;;  %881 = vmatprep.subr.bf16.mxu0 %v1129_v13  ;;  %v308_v49 = vmul.f32 %v291_v42, %v252_v46 }
  0x99   : > { %834 = vmatmul.mubr.msk.f32.gmra.mrb[2].mxu0 %vm313_vm0, %v306_v44 }
  0x9a   : > { %883 = vmatpush3.bf16.msra.mxu0 %v1129_v13  ;;  %v296_v48 = vpop.permute.xlu0 %295  ;;  %836 = vmatprep.mubr.msk.f32.mxu0 %vm313_vm0, %v307_v45  ;;  %v301_v51 = vpop.permute.xlu1 %300 }
  0x9b   : > { %v309_v50 = vmul.f32 %v296_v48, %v253_v47  ;;  %885 = vmatprep.subr.bf16.mxu0 %v1147_v18  ;;  %v310_v53 = vmul.f32 %v301_v51, %v254_v52 }
  0x9d   : > { %837 = vmatmul.mubr.msk.f32.gmra.mrb[4].mxu0 %vm313_vm0, %v308_v49 }
  0x9e   : > { %887 = vmatpush3.bf16.msra.mxu0 %v1147_v18  ;;  %839 = vmatprep.mubr.msk.f32.mxu0 %vm313_vm0, %v309_v50 }
  0x9f   : > { %889 = vmatprep.subr.bf16.mxu0 %v888_v24 }
  0xa1   : > { %840 = vmatmul.mubr.msk.f32.gmra.mrb[6].mxu0 %vm313_vm0, %v310_v53 }
  0xa2   : > { %891 = vmatpush3.bf16.msra.mxu0 %v888_v24  ;;  %858 = vmatprep.mubr.msk.f32.mxu0 %vm465_vm2, %v449_v54 }
  0xa5   : > { %859 = vmatmul.mubr.msk.f32.vlgmr.msra.gmra.mrb[8].mxu0 %vm465_vm2, %v450_v55 }
  0xf6   : > { %v863_v56 = vpop.f32.mrb[0].mxu1 }
  0xf7   : > { %v566_v57 = vpop.f32.mrb[1].mxu1 }
  0xfa   : > { %v866_v58 = vpop.f32.mrb[2].mxu1 }
  0xfb   : > { %v576_v59 = vpop.f32.mrb[3].mxu1 }
  0xfe   : > { %v869_v60 = vpop.f32.mrb[4].mxu1 }
  0xff   : > { %v586_v61 = vpop.f32.mrb[5].mxu1 }
 0x168   : > { %v832_v62 = vpop.f32.mrb[0].mxu0 }
 0x169   : > { %v410_v63 = vpop.f32.mrb[1].mxu0 }
 0x16c   : > { %v835_v0 = vpop.f32.mrb[2].mxu0 }
 0x16d   : > { %v598_v1 = vmul.f32 %v863_v56, %v835_v0  ;;  %v420_v2 = vpop.f32.mrb[3].mxu0 }
 0x16e   : > { %v597_v3 = vmul.f32 %v566_v57, %v420_v2 }
 0x16f   : > { %v625_v8 = vsel %vm603_vm3, %v598_v1, 0.0 }
 0x170   : > { %v838_v4 = vpop.f32.mrb[4].mxu0  ;;  %v618_v5 = vsel %vm603_vm3, %v597_v3, 0.0  ;;  %v626_v14 = vrot.slane %v625_v8, 4 }
 0x171   : > { %v600_v6 = vmul.f32 %v866_v58, %v838_v4  ;;  %v430_v7 = vpop.f32.mrb[5].mxu0  ;;  %v619_v10 = vrot.slane %v618_v5, 4 }
 0x172   : > { %v599_v9 = vmul.f32 %v576_v59, %v430_v7  ;;  %v627_v24 = vadd.f32 %v626_v14, %v625_v8 }
 0x173   : > { %v639_v11 = vsel %vm603_vm3, %v600_v6, 0.0  ;;  %v620_v21 = vadd.f32 %v619_v10, %v618_v5 }
 0x174   : > { %v632_v12 = vsel %vm603_vm3, %v599_v9, 0.0  ;;  %v841_v13 = vpop.f32.mrb[6].mxu0  ;;  %v640_v19 = vrot.slane %v639_v11, 4  ;;  %v628_v37 = vrot.slane %v627_v24, 2 }
 0x175   : > { %v602_v15 = vmul.f32 %v869_v60, %v841_v13  ;;  %v440_v16 = vpop.f32.mrb[7].mxu0  ;;  %v633_v17 = vrot.slane %v632_v12, 4  ;;  %v621_v33 = vrot.slane %v620_v21, 2 }
 0x176   : > { %v601_v18 = vmul.f32 %v586_v61, %v440_v16  ;;  %v641_v31 = vadd.f32 %v640_v19, %v639_v11  ;;  %v629_v47 = vadd.f32 %v628_v37, %v627_v24 }
 0x177   : > { %v653_v20 = vsel %vm603_vm3, %v602_v15, 0.0  ;;  %v634_v29 = vadd.f32 %v633_v17, %v632_v12  ;;  %v622_v44 = vadd.f32 %v621_v33, %v620_v21 }
 0x178   : > { %v646_v22 = vsel %vm603_vm3, %v601_v18, 0.0  ;;  %v860_v23 = vpop.f32.mrb[8].mxu0  ;;  %v654_v25 = vrot.slane %v653_v20, 4  ;;  %v642_v42 = vrot.slane %v641_v31, 2  ;;  %v630_v57 = vrot.slane %v629_v47, 1 }
 0x179   : > { %v647_v26 = vrot.slane %v646_v22, 4  ;;  %v596_v27 = vmul.f32 %v860_v23, %v832_v62  ;;  %v556_v28 = vpop.f32.mrb[9].mxu0  ;;  %v635_v40 = vrot.slane %v634_v29, 2  ;;  %v623_v54 = vrot.slane %v622_v44, 1 }
 0x17a   : > { %v595_v30 = vmul.f32 %v556_v28, %v410_v63  ;;  %v655_v38 = vadd.f32 %v654_v25, %v653_v20  ;;  %v643_v52 = vadd.f32 %v642_v42, %v641_v31  ;;  %v631_v2 = vadd.f32 %v630_v57, %v629_v47 }
 0x17b   : > { %v611_v32 = vsel %vm603_vm3, %v596_v27, 0.0  ;;  %v648_v34 = vadd.f32 %v647_v26, %v646_v22  ;;  %v636_v50 = vadd.f32 %v635_v40, %v634_v29  ;;  %v624_v0 = vadd.f32 %v623_v54, %v622_v44 }
 0x17c   : > { %v612_v35 = vrot.slane %v611_v32, 4  ;;  %v604_v36 = vsel %vm603_vm3, %v595_v30, 0.0  ;;  %v656_v48 = vrot.slane %v655_v38, 2  ;;  %v644_v62 = vrot.slane %v643_v52, 1 }
 0x17d   : > { %v605_v39 = vrot.slane %v604_v36, 4  ;;  %v649_v45 = vrot.slane %v648_v34, 2  ;;  %v637_v60 = vrot.slane %v636_v50, 1 }
 0x17e   : > { %v613_v41 = vadd.f32 %v612_v35, %v611_v32  ;;  %v657_v58 = vadd.f32 %v656_v48, %v655_v38  ;;  %v645_v7 = vadd.f32 %v644_v62, %v643_v52 }
 0x17f   : > { %v606_v43 = vadd.f32 %v605_v39, %v604_v36  ;;  %v650_v55 = vadd.f32 %v649_v45, %v648_v34  ;;  %v638_v5 = vadd.f32 %v637_v60, %v636_v50 }
 0x180   : > { %v614_v46 = vrot.slane %v613_v41, 2  ;;  %v658_v3 = vrot.slane %v657_v58, 1 }
 0x181   : > { %v607_v49 = vrot.slane %v606_v43, 2  ;;  %v651_v1 = vrot.slane %v650_v55, 1 }
 0x182   : > { %v615_v51 = vadd.f32 %v614_v46, %v613_v41  ;;  %v659_v11 = vadd.f32 %v658_v3, %v657_v58 }
 0x183   : > { %v608_v53 = vadd.f32 %v607_v49, %v606_v43  ;;  %v652_v9 = vadd.f32 %v651_v1, %v650_v55 }
 0x184   : > { %v616_v56 = vrot.slane %v615_v51, 1 }
 0x185   : > { %v609_v59 = vrot.slane %v608_v53, 1 }
 0x186   : > { %v617_v61 = vadd.f32 %v616_v56, %v615_v51 }
 0x187   : > { %v610_v63 = vadd.f32 %v609_v59, %v608_v53 }
 0x189   : > { %v669_v4 = vsel %vm668_vm4, %v617_v61, %v610_v63 }
 0x18a   : > { %v671_v6 = vsel %vm670_vm5, %v624_v0, %v669_v4 }
 0x18b   : > { %v673_v8 = vsel %vm672_vm6, %v631_v2, %v671_v6 }
 0x18c   : > { %v675_v10 = vsel %vm674_vm7, %v638_v5, %v673_v8 }
 0x18d   : > { %v677_v12 = vsel %vm676_vm8, %v645_v7, %v675_v10 }
 0x18e   : > { %v679_v13 = vsel %vm678_vm9, %v652_v9, %v677_v12 }
 0x18f   : > { %v681_v14 = vsel %vm680_vm10, %v659_v11, %v679_v13 }
 0x190   : > { %683 = vst.msk [vmem:[%s234_s6] sm:$0xff] %vm603_vm3, %v681_v14 }
 0x191   : > { %955 = shalt.err (!%p952_p3)
}
 0x192   : > { %s956_s17 = scalar_lea.hbm %s1234_s12, 128  ;;  %s960_s25 = scalar_lea.hbm %s1284_s5, 256 }
 0x193   : > { %p957_p4 = scmp.ne.s32.totalorder %s1234_s12, %s956_s17  ;;  %p961_p9 = scmp.lt.u32.totalorder %s1234_s12, %s1284_s5 }
 0x194   : > { %p962_p10 = scmp.lt.u32.totalorder %s960_s25, %s956_s17  ;;  %p964_p12 = scmp.lt.u32.totalorder %s956_s17, %s1234_s12 }
 0x195   : > { %p958_p7 = pnand %p957_p4, %p1076_p5 }
 0x196   : > { %p963_p11 = por %p962_p10, %p961_p9 }
 0x197   : > { %p959_p8 = pneg %p958_p7 }
 0x198   : > { %p965_p13 = por %p964_p12, %p963_p11 }
 0x19a   : > { %p966_p0 = pnand %p965_p13, %p959_p8 }
 0x19c   : > { %969 = shalt.err (!%p966_p0)
}
 0x19d   : > { %900 = dma.vmem_to_hbm [thread:$0]  (%p1076_p5), %s1236_s7, 128, %s1234_s12, %s685_s22  }
 0x19e PF: > { %p906_p1 = scmp.ge.s32.totalorder %s1004_s21, 2  ;;  %s710_s30 = sand.u32 1, %s992_s18  }
 0x19f   : > { %s711_s6 = scalar_lea.sflag [#allocation3], %s710_s30 }
 0x1a0   : > { %p903_p2 = pnand %p906_p1, %p1080_p6 }
 0x1a2   : > { %987 = dma.done.wait (!%p903_p2), %s711_s6, 128  }
 0x1a3   : > { %989 = vsyncadd (!%p903_p2), %s711_s6, 4294967168  ;;  %p15_p3 = scmp.ge.s32.totalorder %s1063_s24, 4   ;;  %s1288_s18 = smov %s996_s19 }
 0x1a4   : > { %s1289_s19 = smov %s1000_s20  ;;  %s1290_s20 = smov %s1074_s27 }
 0x1a5   : > { %s1291_s21 = smov %s1063_s24  ;;  %17 = sbr.rel (!%p15_p3) target bundleno = 3 (0x3), region = 78 }
 0x1ac   :  { %716 = vsyncpa [#allocation3], 1 }
 0x1ad   :  { %718 = vsyncpa [#allocation3 + $0x1], 1 }

</bundles_post_ra>
